<compile_context>
chip_gen: v7x
topology: tpu7x:2x2x1
jax: 0.10.0
libtpu: 0.0.40
codegen_flags: <defaults>
</compile_context>

<pallas_src>
import jax
import jax.numpy as jnp
import numpy as np
from jax.experimental import pallas as pl
from jax.experimental.pallas import tpu as pltpu


# ----------------------------------------------------------------------------
# Generation-aware VMEM budgeting
# ----------------------------------------------------------------------------
def _round_up(n, m):
    return ((n + m - 1) // m) * m


def _vmem_limit_bytes():
    """Scoped-VMEM limit we request from Mosaic, derived from physical VMEM."""
    try:
        cap = int(pltpu.get_tpu_info().vmem_capacity_bytes)
    except Exception:
        cap = 64 * 1024 * 1024          # conservative (v7x per-TC physical)
    return min((cap * 3) // 4, 96 * 1024 * 1024)


def _fused_resident_bytes(B, D_pad, c_pad):
    """Raw resident bytes of the fused (W-in-VMEM) kernel."""
    w_b = D_pad * c_pad * 2                        # bf16 W
    x_b = B * D_pad * 2                            # bf16 x
    grad_b = B * D_pad * 4                         # f32 grad out
    small = (2 * B * c_pad + B * 128 + c_pad) * 4  # logits/yoh/loss/bias
    return w_b + x_b + grad_b + small


# ----------------------------------------------------------------------------
# Kernels
# ----------------------------------------------------------------------------
def eot_fused_kernel(x_ref, w_ref, b_ref, yoh_ref, logits_ref, loss_ref,
                     grad_ref):
    """Single-pass fwd+bwd with W fully resident in VMEM (W read once).

    x_ref:      (B, Dp)     bf16   flattened (padded) audio
    w_ref:      (Dp, Cpad)  bf16   classifier weight (resident)
    b_ref:      (1, Cpad)   f32    bias (padded classes = -1e30)
    yoh_ref:    (B, Cpad)   f32    one-hot labels (padded classes = 0)
    logits_ref: (B, Cpad)   f32    OUT scores
    loss_ref:   (B, 128)    f32    OUT per-sample CE, lane-dense slab
    grad_ref:   (B, Dp)     f32    OUT dL/dx
    """
    logits = jnp.dot(x_ref[...], w_ref[...],
                     preferred_element_type=jnp.float32) + b_ref[...]
    logits_ref[...] = logits

    # Numerically-stable softmax / log-softmax. Padded classes carry a -1e30
    # bias -> exp underflows to 0 and 0 * (-1e30) = 0 in the CE dot.
    m = jnp.max(logits, axis=-1, keepdims=True)
    shifted = logits - m
    e = jnp.exp(shifted)
    s = jnp.sum(e, axis=-1, keepdims=True)
    logp = shifted - jnp.log(s)

    loss = -jnp.sum(yoh_ref[...] * logp, axis=-1, keepdims=True)   # (B, 1)
    loss_ref[...] = jnp.broadcast_to(loss, loss_ref.shape)

    p = e / s                                   # exact division (runs once)
    dl = (p - yoh_ref[...]).astype(jnp.bfloat16)
    # grad = dlogits @ W^T : contract class dim of both operands, bf16 MXU.
    grad_ref[...] = jax.lax.dot_general(
        dl, w_ref[...],
        dimension_numbers=(((1,), (1,)), ((), ())),
        preferred_element_type=jnp.float32)


def eot_fwd_partial_kernel(x_ref, w_ref, part_ref):
    """Streaming forward: per-core partial logits over D tiles.

    grid = (n_split [parallel], nk_per [arbitrary/reduction])
    x_ref:    (B, tk)          bf16
    w_ref:    (tk, Cpad)       bf16
    part_ref: (1, B, Cpad)     f32   per-split accumulator (resident over k)
    """
    k = pl.program_id(1)
    part = jnp.dot(x_ref[...], w_ref[...],
                   preferred_element_type=jnp.float32)

    @pl.when(k == 0)
    def _init():
        part_ref[...] = part[None, :, :]

    @pl.when(k > 0)
    def _accum():
        part_ref[...] += part[None, :, :]


def eot_bwd_kernel(dl_ref, w_ref, grad_ref):
    """Streaming backward over independent D tiles ("parallel").

    dl_ref:   (B, Cpad)   bf16  dL/dlogits (resident, tiny)
    w_ref:    (tk, Cpad)  bf16  weight tile (streamed, stays bf16)
    grad_ref: (B, tk)     f32   OUT dL/dx tile
    """
    grad_ref[...] = jax.lax.dot_general(
        dl_ref[...], w_ref[...],
        dimension_numbers=(((1,), (1,)), ((), ())),
        preferred_element_type=jnp.float32)


# ----------------------------------------------------------------------------
# pallas_call wrappers
# ----------------------------------------------------------------------------
def _fused_call(x_bf, w_bf, b_pad, yoh, vmem_limit):
    B, D_pad = x_bf.shape
    c_pad = w_bf.shape[1]
    out_shapes = (
        jax.ShapeDtypeStruct((B, c_pad), jnp.float32),   # logits
        jax.ShapeDtypeStruct((B, 128), jnp.float32),     # loss slab
        jax.ShapeDtypeStruct((B, D_pad), jnp.float32),   # grad
    )
    return pl.pallas_call(
        eot_fused_kernel,
        out_shape=out_shapes,
        grid_spec=pltpu.PrefetchScalarGridSpec(
            num_scalar_prefetch=0,
            grid=(1,),
            in_specs=[
                pl.BlockSpec((B, D_pad), lambda i: (0, 0)),
                pl.BlockSpec((D_pad, c_pad), lambda i: (0, 0)),
                pl.BlockSpec((1, c_pad), lambda i: (0, 0)),
                pl.BlockSpec((B, c_pad), lambda i: (0, 0)),
            ],
            out_specs=[
                pl.BlockSpec((B, c_pad), lambda i: (0, 0)),
                pl.BlockSpec((B, 128), lambda i: (0, 0)),
                pl.BlockSpec((B, D_pad), lambda i: (0, 0)),
            ],
        ),
        compiler_params=pltpu.CompilerParams(
            dimension_semantics=("arbitrary",),
            vmem_limit_bytes=vmem_limit),
    )(x_bf, w_bf, b_pad, yoh)


def _fwd_partial_call(x_bf, w_bf, block_d, n_split, vmem_limit):
    B, D_pad = x_bf.shape
    c_pad = w_bf.shape[1]
    nk = D_pad // block_d
    nk_per = nk // n_split
    return pl.pallas_call(
        eot_fwd_partial_kernel,
        out_shape=jax.ShapeDtypeStruct((n_split, B, c_pad), jnp.float32),
        grid_spec=pltpu.PrefetchScalarGridSpec(
            num_scalar_prefetch=0,
            grid=(n_split, nk_per),
            in_specs=[
                pl.BlockSpec((B, block_d),
                             lambda p, k: (0, p * nk_per + k)),     # x tile
                pl.BlockSpec((block_d, c_pad),
                             lambda p, k: (p * nk_per + k, 0)),     # W tile
            ],
            out_specs=pl.BlockSpec((1, B, c_pad), lambda p, k: (p, 0, 0)),
        ),
        compiler_params=pltpu.CompilerParams(
            # leading axis shards the D reduction across TensorCores (v7x);
            # trailing axis is the per-core reduction (accumulator output).
            dimension_semantics=("parallel", "arbitrary"),
            vmem_limit_bytes=vmem_limit),
    )(x_bf, w_bf)


def _bwd_call(dl_bf, w_bf, block_d, vmem_limit):
    B, c_pad = dl_bf.shape
    D_pad = w_bf.shape[0]
    nk = D_pad // block_d
    return pl.pallas_call(
        eot_bwd_kernel,
        out_shape=jax.ShapeDtypeStruct((B, D_pad), jnp.float32),
        grid_spec=pltpu.PrefetchScalarGridSpec(
            num_scalar_prefetch=0,
            grid=(nk,),
            in_specs=[
                pl.BlockSpec((B, c_pad), lambda k: (0, 0)),        # dl resident
                pl.BlockSpec((block_d, c_pad), lambda k: (k, 0)),  # W streamed
            ],
            out_specs=pl.BlockSpec((B, block_d), lambda k: (0, k)),
        ),
        compiler_params=pltpu.CompilerParams(
            dimension_semantics=("parallel",),
            vmem_limit_bytes=vmem_limit),
    )(dl_bf, w_bf)


# ----------------------------------------------------------------------------
# EOT.forward equivalent
# ----------------------------------------------------------------------------
def eot_forward(x_batch, y_batch, w, b, n_classes,
                EOT_num_batches=2, EOT_batch_size=2, use_grad=True,
                block_d=None, force_streaming=False):
    """Reproduces EOT.forward semantics for the built-in linear+CE model.

    x_batch: (n_audios, n_channels, max_len) f32
    y_batch: (n_audios,) int32
    Returns (scores, loss, grad, decisions) like the PyTorch module.

    Note: the dominant cost (streaming W) is independent of the batch size, so
    callers should concatenate audios into one call where possible.
    """
    n_audios, n_channels, max_len = x_batch.shape
    D = n_channels * max_len
    c_pad = _round_up(n_classes, 128)
    vmem_limit = _vmem_limit_bytes()

    # --- choose path & D padding --------------------------------------------
    if block_d is None:
        block_d = min(8192, _round_up(D, 128))
    block_d = _round_up(block_d, 128)

    fused_budget = min(vmem_limit // 2, 32 * 1024 * 1024)
    use_fused = (not force_streaming) and (
        _fused_resident_bytes(n_audios, _round_up(D, 128), c_pad)
        <= fused_budget)

    D_pad = _round_up(D, 128) if use_fused else _round_up(D, block_d)

    # --- kernel-boundary packing (bf16 operands; no f32 W temp) --------------
    x_flat = x_batch.reshape(n_audios, D).astype(jnp.bfloat16)
    if D_pad != D:
        x_flat = jnp.pad(x_flat, ((0, 0), (0, D_pad - D)))
    w_bf = jnp.pad(w.astype(jnp.bfloat16),
                   ((0, D_pad - D), (0, c_pad - n_classes)))
    b_pad = jnp.full((1, c_pad), -1e30, jnp.float32).at[:, :n_classes].set(b)
    yoh = jax.nn.one_hot(y_batch, c_pad, dtype=jnp.float32)

    # --- launch ---------------------------------------------------------------
    if use_fused:
        # Single HBM pass over W (resident in VMEM); fwd + epilogue + bwd fused.
        logits_pad, loss_slab, grad_pad = _fused_call(
            x_flat, w_bf, b_pad, yoh, vmem_limit)
        loss1 = loss_slab[:, 0]
        grad_flat = grad_pad[:, :D] if use_grad else None
    else:
        # Streamed W: partial logits per core, tiny epilogue in plain JAX,
        # second W pass for the gradient.
        nk = D_pad // block_d
        n_split = 2 if (nk >= 2 and nk % 2 == 0) else 1
        partials = _fwd_partial_call(x_flat, w_bf, block_d, n_split, vmem_limit)
        logits_pad = jnp.sum(partials, axis=0) + b_pad           # (B, Cpad)
        m = jnp.max(logits_pad, axis=-1, keepdims=True)
        e = jnp.exp(logits_pad - m)
        s = jnp.sum(e, axis=-1, keepdims=True)
        logp = (logits_pad - m) - jnp.log(s)
        loss1 = -jnp.sum(yoh * logp, axis=-1)                    # (B,)
        if use_grad:
            dl_bf = (e / s - yoh).astype(jnp.bfloat16)           # (B, Cpad)
            grad_flat = _bwd_call(dl_bf, w_bf, block_d, vmem_limit)[:, :D]
        else:
            grad_flat = None

    # --- EOT accumulation (exact for the deterministic model) ----------------
    scale = jnp.float32(EOT_num_batches)
    scores = scale * logits_pad[:, :n_classes]
    loss = scale * loss1
    grad = (scale * grad_flat).reshape(n_audios, n_channels, max_len) \
        if use_grad else None

    # model.make_decision -> argmax; single host pull after all launches.
    dec_np = np.asarray(jnp.argmax(logits_pad[:, :n_classes], axis=-1))
    total_repeats = EOT_num_batches * EOT_batch_size
    decisions = [[int(dec_np[i])] * total_repeats for i in range(n_audios)]

    return scores, loss, grad, decisions


# ----------------------------------------------------------------------------
# Self-test
# ----------------------------------------------------------------------------
if __name__ == "__main__":
    n_audios = 2
    n_channels = 1
    max_len = 1024            # D = 1024 (lane-aligned)
    n_classes = 16
    EOT_size = 4
    EOT_batch_size = 2
    EOT_num_batches = EOT_size // EOT_batch_size

    key = jax.random.PRNGKey(0)
    kx, kw, kb, ky = jax.random.split(key, 4)

    x_batch = jax.random.normal(kx, (n_audios, n_channels, max_len),
                                dtype=jnp.float32)
    y_batch = jax.random.randint(ky, (n_audios,), 0, n_classes, dtype=jnp.int32)

    D = n_channels * max_len
    w = 0.02 * jax.random.normal(kw, (D, n_classes), dtype=jnp.float32)
    b = 0.01 * jax.random.normal(kb, (1, n_classes), dtype=jnp.float32)

    # Path 1: fused (W resident in VMEM, single HBM pass over W).
    out_fused = eot_forward(
        x_batch, y_batch, w, b, n_classes,
        EOT_num_batches=EOT_num_batches, EOT_batch_size=EOT_batch_size,
        use_grad=True)

    # Path 2: streaming (forced), block_d=256 -> 4 D-tiles, 2-way parallel
    # split of the forward reduction + separate backward W pass.
    out_stream = eot_forward(
        x_batch, y_batch, w, b, n_classes,
        EOT_num_batches=EOT_num_batches, EOT_batch_size=EOT_batch_size,
        use_grad=True, force_streaming=True, block_d=256)

    jax.block_until_ready((out_fused[0], out_fused[1], out_fused[2],
                           out_stream[0], out_stream[1], out_stream[2]))

    # Pure-JAX reference using the same bf16-rounded matmul inputs
    # (MXU-native precision), f32 everywhere else; dlogits rounded to bf16 as
    # the kernels do for the backward matmul.
    x_bf = x_batch.reshape(n_audios, D).astype(jnp.bfloat16).astype(jnp.float32)
    w_ref = w.astype(jnp.bfloat16).astype(jnp.float32)
    logits_ref = x_bf @ w_ref + b
    lse = jax.nn.logsumexp(logits_ref, axis=-1, keepdims=True)
    logp_ref = logits_ref - lse
    loss_ref = -jnp.take_along_axis(logp_ref, y_batch[:, None], axis=-1)[:, 0]
    p_ref = jax.nn.softmax(logits_ref, axis=-1)
    dl_ref = (p_ref - jax.nn.one_hot(y_batch, n_classes)) \
        .astype(jnp.bfloat16).astype(jnp.float32)
    grad_ref = (dl_ref @ w_ref.T).reshape(n_audios, n_channels, max_len)

    for name, (scores, loss, grad, decisions) in (("fused", out_fused),
                                                  ("stream", out_stream)):
        assert scores.shape == (n_audios, n_classes), name
        assert loss.shape == (n_audios,), name
        assert grad.shape == (n_audios, n_channels, max_len), name
        assert len(decisions) == n_audios, name
        assert all(len(d) == EOT_num_batches * EOT_batch_size
                   for d in decisions), name

        np.testing.assert_allclose(np.asarray(scores),
                                   np.asarray(EOT_num_batches * logits_ref),
                                   rtol=1e-4, atol=1e-4)
        np.testing.assert_allclose(np.asarray(loss),
                                   np.asarray(EOT_num_batches * loss_ref),
                                   rtol=1e-4, atol=1e-4)
        # bf16 dlogits in the backward matmul -> ~1e-3 relative on grad.
        np.testing.assert_allclose(np.asarray(grad),
                                   np.asarray(EOT_num_batches * grad_ref),
                                   rtol=1e-2, atol=1e-4)

    print("KERNEL_OK")
</pallas_src>

<mosaic_0001>
module attributes {stable_mosaic.version = 11 : i64} {
  func.func @eot_fused_kernel(%arg0: i32, %arg1: memref<2x1024xbf16, #tpu.memory_space<vmem>>, %arg2: memref<1024x128xbf16, #tpu.memory_space<vmem>>, %arg3: memref<1x128xf32, #tpu.memory_space<vmem>>, %arg4: memref<2x128xf32, #tpu.memory_space<vmem>>, %arg5: memref<2x128xf32, #tpu.memory_space<vmem>>, %arg6: memref<2x128xf32, #tpu.memory_space<vmem>>, %arg7: memref<2x1024xf32, #tpu.memory_space<vmem>>) attributes {dimension_semantics = [#tpu.dimension_semantics<arbitrary>], iteration_bounds = array<i64: 1>, scalar_prefetch = 0 : i64, scratch_operands = 0 : i64, tpu.core_type = #tpu.core_type<tc>, window_params = [{pipeline_mode = #tpu.pipeline_mode<synchronous>, transform_indices = @transform_0, window_bounds = array<i64: 2, 1024>}, {pipeline_mode = #tpu.pipeline_mode<synchronous>, transform_indices = @transform_1, window_bounds = array<i64: 1024, 128>}, {pipeline_mode = #tpu.pipeline_mode<synchronous>, transform_indices = @transform_2, window_bounds = array<i64: 1, 128>}, {pipeline_mode = #tpu.pipeline_mode<synchronous>, transform_indices = @transform_3, window_bounds = array<i64: 2, 128>}, {pipeline_mode = #tpu.pipeline_mode<synchronous>, transform_indices = @transform_4, window_bounds = array<i64: 2, 128>}, {pipeline_mode = #tpu.pipeline_mode<synchronous>, transform_indices = @transform_5, window_bounds = array<i64: 2, 128>}, {pipeline_mode = #tpu.pipeline_mode<synchronous>, transform_indices = @transform_6, window_bounds = array<i64: 2, 1024>}]} {
    %c0 = arith.constant 0 : index
    %c0_0 = arith.constant 0 : index
    %0 = vector.load %arg1[%c0, %c0_0] : memref<2x1024xbf16, #tpu.memory_space<vmem>>, vector<2x1024xbf16>
    %c0_1 = arith.constant 0 : index
    %c0_2 = arith.constant 0 : index
    %1 = vector.load %arg2[%c0_1, %c0_2] : memref<1024x128xbf16, #tpu.memory_space<vmem>>, vector<1024x128xbf16>
    %cst = arith.constant dense<0.000000e+00> : vector<2x128xf32>
    %2 = tpu.matmul %0, %1, %cst {dimension_numbers = #tpu.dot_dimension_numbers<[1], [0], [0], [1], [0, 0, 1, 1], [], []>} : vector<2x1024xbf16>, vector<1024x128xbf16>, vector<2x128xf32> -> vector<2x128xf32>
    %c0_3 = arith.constant 0 : index
    %c0_4 = arith.constant 0 : index
    %3 = vector.load %arg3[%c0_3, %c0_4] : memref<1x128xf32, #tpu.memory_space<vmem>>, vector<1x128xf32>
    %4 = vector.broadcast %3 : vector<1x128xf32> to vector<2x128xf32>
    %5 = arith.addf %2, %4 : vector<2x128xf32>
    %c0_5 = arith.constant 0 : index
    %c0_6 = arith.constant 0 : index
    %6 = vector.load %arg5[%c0_5, %c0_6] : memref<2x128xf32, #tpu.memory_space<vmem>>, vector<2x128xf32>
    tpu.vector_store %arg5[%c0_5, %c0_6], %5 {strides = array<i32>} : memref<2x128xf32, #tpu.memory_space<vmem>>, vector<2x128xf32>,
    %cst_7 = arith.constant dense<0xFF800000> : vector<2xf32>
    %7 = vector.multi_reduction <maximumf>, %5, %cst_7 [1] : vector<2x128xf32> to vector<2xf32>
    %8 = vector.shape_cast %7 : vector<2xf32> to vector<2x1xf32>
    %9 = vector.broadcast %8 : vector<2x1xf32> to vector<2x128xf32>
    %10 = arith.subf %5, %9 : vector<2x128xf32>
    %11 = math.exp %10 : vector<2x128xf32>
    %cst_8 = arith.constant dense<0.000000e+00> : vector<2xf32>
    %12 = vector.multi_reduction <add>, %11, %cst_8 [1] : vector<2x128xf32> to vector<2xf32>
    %13 = vector.shape_cast %12 : vector<2xf32> to vector<2x1xf32>
    %14 = math.log %13 : vector<2x1xf32>
    %15 = vector.broadcast %14 : vector<2x1xf32> to vector<2x128xf32>
    %16 = arith.subf %10, %15 : vector<2x128xf32>
    %c0_9 = arith.constant 0 : index
    %c0_10 = arith.constant 0 : index
    %17 = vector.load %arg4[%c0_9, %c0_10] : memref<2x128xf32, #tpu.memory_space<vmem>>, vector<2x128xf32>
    %18 = arith.mulf %17, %16 : vector<2x128xf32>
    %cst_11 = arith.constant dense<0.000000e+00> : vector<2xf32>
    %19 = vector.multi_reduction <add>, %18, %cst_11 [1] : vector<2x128xf32> to vector<2xf32>
    %20 = vector.shape_cast %19 : vector<2xf32> to vector<2x1xf32>
    %cst_12 = arith.constant 0.000000e+00 : f32
    %21 = vector.broadcast %cst_12 : f32 to vector<2x1xf32>
    %22 = arith.subf %21, %20 : vector<2x1xf32>
    %23 = vector.shape_cast %22 : vector<2x1xf32> to vector<2x1xf32>
    %24 = vector.broadcast %23 : vector<2x1xf32> to vector<2x128xf32>
    %c0_13 = arith.constant 0 : index
    %c0_14 = arith.constant 0 : index
    %25 = vector.load %arg6[%c0_13, %c0_14] : memref<2x128xf32, #tpu.memory_space<vmem>>, vector<2x128xf32>
    tpu.vector_store %arg6[%c0_13, %c0_14], %24 {strides = array<i32>} : memref<2x128xf32, #tpu.memory_space<vmem>>, vector<2x128xf32>,
    %26 = vector.broadcast %13 : vector<2x1xf32> to vector<2x128xf32>
    %27 = arith.divf %11, %26 : vector<2x128xf32>
    %c0_15 = arith.constant 0 : index
    %c0_16 = arith.constant 0 : index
    %28 = vector.load %arg4[%c0_15, %c0_16] : memref<2x128xf32, #tpu.memory_space<vmem>>, vector<2x128xf32>
    %29 = arith.subf %27, %28 : vector<2x128xf32>
    %30 = arith.truncf %29 : vector<2x128xf32> to vector<2x128xbf16>
    %c0_17 = arith.constant 0 : index
    %c0_18 = arith.constant 0 : index
    %31 = vector.load %arg2[%c0_17, %c0_18] : memref<1024x128xbf16, #tpu.memory_space<vmem>>, vector<1024x128xbf16>
    %cst_19 = arith.constant dense<0.000000e+00> : vector<2x1024xf32>
    %32 = tpu.matmul %30, %31, %cst_19 {dimension_numbers = #tpu.dot_dimension_numbers<[1], [1], [0], [0], [0, 0, 1, 0], [], []>} : vector<2x128xbf16>, vector<1024x128xbf16>, vector<2x1024xf32> -> vector<2x1024xf32>
    %c0_20 = arith.constant 0 : index
    %c0_21 = arith.constant 0 : index
    %33 = vector.load %arg7[%c0_20, %c0_21] : memref<2x1024xf32, #tpu.memory_space<vmem>>, vector<2x1024xf32>
    tpu.vector_store %arg7[%c0_20, %c0_21], %32 {strides = array<i32>} : memref<2x1024xf32, #tpu.memory_space<vmem>>, vector<2x1024xf32>,
    return
  }
  func.func @transform_0(%arg0: i32) -> (i32, i32) {
    %c0_i32 = arith.constant 0 : i32
    %c0_i32_0 = arith.constant 0 : i32
    %c0_i32_1 = arith.constant 0 : i32
    return %c0_i32, %c0_i32_0 : i32, i32
  }
  func.func @transform_1(%arg0: i32) -> (i32, i32) {
    %c0_i32 = arith.constant 0 : i32
    %c0_i32_0 = arith.constant 0 : i32
    %c0_i32_1 = arith.constant 0 : i32
    return %c0_i32, %c0_i32_0 : i32, i32
  }
  func.func @transform_2(%arg0: i32) -> (i32, i32) {
    %c0_i32 = arith.constant 0 : i32
    %c0_i32_0 = arith.constant 0 : i32
    %c0_i32_1 = arith.constant 0 : i32
    return %c0_i32, %c0_i32_0 : i32, i32
  }
  func.func @transform_3(%arg0: i32) -> (i32, i32) {
    %c0_i32 = arith.constant 0 : i32
    %c0_i32_0 = arith.constant 0 : i32
    %c0_i32_1 = arith.constant 0 : i32
    return %c0_i32, %c0_i32_0 : i32, i32
  }
  func.func @transform_4(%arg0: i32) -> (i32, i32) {
    %c0_i32 = arith.constant 0 : i32
    %c0_i32_0 = arith.constant 0 : i32
    %c0_i32_1 = arith.constant 0 : i32
    return %c0_i32, %c0_i32_0 : i32, i32
  }
  func.func @transform_5(%arg0: i32) -> (i32, i32) {
    %c0_i32 = arith.constant 0 : i32
    %c0_i32_0 = arith.constant 0 : i32
    %c0_i32_1 = arith.constant 0 : i32
    return %c0_i32, %c0_i32_0 : i32, i32
  }
  func.func @transform_6(%arg0: i32) -> (i32, i32) {
    %c0_i32 = arith.constant 0 : i32
    %c0_i32_0 = arith.constant 0 : i32
    %c0_i32_1 = arith.constant 0 : i32
    return %c0_i32, %c0_i32_0 : i32, i32
  }
}

</mosaic_0001>

<bundles_post_ra>
// kernel: tpu_custom_call.1
= control target key start
LH: loop header
LB: loop body
LE: loop exit
PB: predicated region body
PF: predicated region fallthrough
CT: control target
= control target key end

     0   :  { %12 = vsyncpa [#allocation3], 0  ;;  %s2279_s0 = inlined_call_operand.hbm [shape: bf16[2,1024], index: 0, kind: input, shape index: {}]   ;;  %s2280_s1 = inlined_call_operand.hbm [shape: bf16[1024,128], index: 1, kind: input, shape index: {}]   ;;  %s2281_s2 = inlined_call_operand.vmem [shape: f32[1,128], index: 2, kind: input, shape index: {}]   ;;  %s2282_s3 = inlined_call_operand.vmem [shape: f32[2,128], index: 3, kind: input, shape index: {}]   ;;  %s2283_s4 = inlined_call_operand.hbm [shape: f32[2,128], index: 4, kind: output, shape index: {0}]   ;;  %s2284_s5 = inlined_call_operand.hbm [shape: f32[2,128], index: 5, kind: output, shape index: {1}]   ;;  %s2285_s6 = inlined_call_operand.hbm [shape: f32[2,1024], index: 6, kind: output, shape index: {2}]  }
   0x1   :  { %13 = vsyncpa [#allocation6], 0 }
   0x2   :  { %14 = vsyncpa [#allocation4], 0 }
   0x3   :  { %15 = vsyncpa [#allocation9], 0  ;;  %s2129_s21 = smov [#allocation2]   ;;  %s2130_s23 = smov [#allocation5]  }
   0x4   :  { %s22_s22 = sshll.u32 %s2129_s21, 4  ;;  %s31_s24 = sshll.u32 %s2130_s23, 4  ;;  %s23_s22 = int_to_ptr.vmem [resolvable:$true] %s22_s22  ;;  %s2173_s24 = int_to_ptr.vmem [resolvable:$true] %s31_s24 }
   0x5   :  { %s2011_s27 = scalar_lea.hbm %s2279_s0, 128 }
   0x6   :  { %p2012_p0 = scmp.ne.s32.totalorder %s2279_s0, %s2011_s27  ;;  %p2015_p1 = scmp.lt.u32.totalorder %s2011_s27, %s2279_s0 }
   0x8   :  { %p2017_p2 = pnand %p2015_p1, %p2012_p0 }
   0xa   :  { %2020 = shalt.err (!%p2017_p2)
}
   0xb   :  { %s2021_s8 = scalar_lea.vmem %s23_s22, 128  ;;  %p2026_p4 = scmp.lt.s32.totalorder %s23_s22, %s23_s22 }
   0xc   :  { %p2022_p3 = scmp.ne.s32.totalorder %s23_s22, %s2021_s8  ;;  %p2027_p5 = scmp.lt.s32.totalorder %s2021_s8, %s2021_s8 }
   0xe   :  { %p2028_p6 = por %p2027_p5, %p2026_p4 }
  0x10   :  { %p2029_p7 = pnand %p2028_p6, %p2022_p3 }
  0x12   :  { %2032 = shalt.err (!%p2029_p7)
}
  0x13   :  { %25 = dma.hbm_to_vmem [thread:$0]  %s2279_s0, 128, %s23_s22, [#allocation3]  }
  0x14   :  { %s2033_s13 = scalar_lea.hbm %s2280_s1, 8192 }
  0x15   :  { %p2034_p8 = scmp.ne.s32.totalorder %s2280_s1, %s2033_s13  ;;  %p2037_p9 = scmp.lt.u32.totalorder %s2033_s13, %s2280_s1 }
  0x17   :  { %p2039_p10 = pnand %p2037_p9, %p2034_p8 }
  0x19   :  { %2042 = shalt.err (!%p2039_p10)
}
  0x1a   :  { %s2043_s18 = scalar_lea.vmem %s2173_s24, 8192  ;;  %p2048_p12 = scmp.lt.s32.totalorder %s2173_s24, %s2173_s24 }
  0x1b   :  { %p2044_p11 = scmp.ne.s32.totalorder %s2173_s24, %s2043_s18  ;;  %p2049_p13 = scmp.lt.s32.totalorder %s2043_s18, %s2043_s18 }
  0x1d   :  { %p2050_p0 = por %p2049_p13, %p2048_p12 }
  0x1f   :  { %p2051_p1 = pnand %p2050_p0, %p2044_p11 }
  0x21   :  { %2054 = shalt.err (!%p2051_p1)
}
  0x22   :  { %s2131_s0 = smov 64   ;;  %s2132_s19 = smov 4  }
  0x23   :  { %37 = dma.hbm_to_vmem [thread:$0]  %s2280_s1, 8192, %s2173_s24, [#allocation6], %s2131_s0, %s2131_s0, %s2132_s19  }
  0x24   :  { %2121 = dma.done.wait [#allocation3], 128  }
  0x25   :  { %2122 = vsyncadd [#allocation3], 4294967168 }
  0x26   :  { %2123 = dma.done.wait [#allocation6], 8192  }
  0x27   :  { %2124 = vsyncadd [#allocation6], 4294959104  ;;  %v1876_v0 = vld [vmem:[#allocation5 + $0x40] sm:$0xff]   ;;  %v1880_v4 = vld [vmem:[#allocation5 + $0x48] sm:$0xff]   ;;  %v2133_v22 = vmov 1966171168   ;;  %v190_v24 = vlaneseq }
  0x28   :  { %v1877_v1 = vld [vmem:[#allocation5 + $0xc0] sm:$0xff]   ;;  %1707 = vmatprep.subr.bf16.mxu0 %v1876_v0  ;;  %v1881_v5 = vld [vmem:[#allocation5 + $0xc8] sm:$0xff]   ;;  %v1884_v8 = vld [vmem:[#allocation5 + $0x50] sm:$0xff]   ;;  %v188_v23 = vunpack.c.l.s4 %v2133_v22  ;;  %vm788_vm0 = vcmask 1041408   ;;  %s2135_s27 = smov [#allocation7]  }
  0x29   :  { %v1878_v2 = vld [vmem:[#allocation5] sm:$0xff]   ;;  %1729 = vmatprep.subr.bf16.mxu1 %v1877_v1  ;;  %v1882_v6 = vld [vmem:[#allocation5 + $0x8] sm:$0xff]   ;;  %v1885_v9 = vld [vmem:[#allocation5 + $0xd0] sm:$0xff]   ;;  %v2204_v30 = vshrl.u32 %v190_v24, 7  ;;  %s1541_s28 = sshll.u32 %s2135_s27, 4  ;;  %s1542_s28 = int_to_ptr.vmem [resolvable:$true] %s1541_s28 }
  0x2a   :  { %v1879_v3 = vld [vmem:[#allocation5 + $0x80] sm:$0xff]   ;;  %1708 = vmatpush3.bf16.msra.mxu0 %v1878_v2  ;;  %v1883_v7 = vld [vmem:[#allocation5 + $0x88] sm:$0xff]   ;;  %v1886_v10 = vld [vmem:[#allocation5 + $0x10] sm:$0xff]   ;;  %v189_v29 = vunpack.c.0.s8 %v188_v23 }
  0x2b   :  { %1730 = vmatpush3.bf16.msra.mxu1 %v1879_v3  ;;  %1709 = vmatprep.subr.bf16.mxu0 %v1880_v4  ;;  %v1887_v11 = vld [vmem:[#allocation5 + $0x90] sm:$0xff]   ;;  %v1888_v12 = vld [vmem:[#allocation5 + $0x58] sm:$0xff]   ;;  %v1892_v16 = vld [vmem:[#allocation5 + $0x60] sm:$0xff]  }
  0x2c   :  { %1731 = vmatprep.subr.bf16.mxu1 %v1881_v5  ;;  %v1889_v13 = vld [vmem:[#allocation5 + $0xd8] sm:$0xff]   ;;  %v1893_v17 = vld [vmem:[#allocation5 + $0xe0] sm:$0xff]   ;;  %v1896_v20 = vld [vmem:[#allocation5 + $0x68] sm:$0xff]   ;;  %v2207_v35 = vsub.s32 %v189_v29, %v2204_v30 }
  0x2d   :  { %v1890_v14 = vld [vmem:[#allocation5 + $0x18] sm:$0xff]   ;;  %v1894_v18 = vld [vmem:[#allocation5 + $0x20] sm:$0xff]   ;;  %v1897_v21 = vld [vmem:[#allocation5 + $0xe8] sm:$0xff]  }
  0x2e   :  { %1710 = vmatpush3.bf16.msra.mxu0 %v1882_v6  ;;  %v1891_v15 = vld [vmem:[#allocation5 + $0x98] sm:$0xff]   ;;  %v1895_v19 = vld [vmem:[#allocation5 + $0xa0] sm:$0xff]   ;;  %v1898_v25 = vld [vmem:[#allocation5 + $0x28] sm:$0xff]  }
  0x2f   :  { %1732 = vmatpush3.bf16.msra.mxu1 %v1883_v7  ;;  %1711 = vmatprep.subr.bf16.mxu0 %v1884_v8  ;;  %v1899_v26 = vld [vmem:[#allocation5 + $0xa8] sm:$0xff]   ;;  %v1900_v27 = vld [vmem:[#allocation5 + $0x70] sm:$0xff]   ;;  %v1904_v33 = vld [vmem:[#allocation5 + $0x78] sm:$0xff]  }
  0x30   :  { %1733 = vmatprep.subr.bf16.mxu1 %v1885_v9  ;;  %v1901_v28 = vld [vmem:[#allocation5 + $0xf0] sm:$0xff]   ;;  %v1905_v34 = vld [vmem:[#allocation5 + $0xf8] sm:$0xff]   ;;  %v1909_v41 = vld [vmem:[#allocation5 + $0x140] sm:$0xff]  }
  0x31   :  { %v1902_v31 = vld [vmem:[#allocation5 + $0x30] sm:$0xff]   ;;  %v1906_v36 = vld [vmem:[#allocation5 + $0x38] sm:$0xff]   ;;  %v1910_v42 = vld [vmem:[#allocation5 + $0x1c0] sm:$0xff]  }
  0x32   :  { %1712 = vmatpush3.bf16.msra.mxu0 %v1886_v10  ;;  %v1903_v32 = vld [vmem:[#allocation5 + $0xb0] sm:$0xff]   ;;  %v1907_v37 = vld [vmem:[#allocation5 + $0xb8] sm:$0xff]   ;;  %v1911_v46 = vld [vmem:[#allocation5 + $0x100] sm:$0xff]  }
  0x33   :  { %1734 = vmatpush3.bf16.msra.mxu1 %v1887_v11  ;;  %1713 = vmatprep.subr.bf16.mxu0 %v1888_v12  ;;  %v49_v38 = vld [vmem:[#allocation2] sm:$0xff]  ;;  %v1912_v48 = vld [vmem:[#allocation5 + $0x180] sm:$0xff]   ;;  %v1913_v51 = vld [vmem:[#allocation5 + $0x148] sm:$0xff]  }
  0x34   :  { %1735 = vmatprep.subr.bf16.mxu1 %v1889_v13  ;;  %v186_v39 = vcombine.high %v49_v38, %v49_v38  ;;  %v193_v40 = vrot.slane %v49_v38, %v2207_v35  ;;  %v1914_v53 = vld [vmem:[#allocation5 + $0x1c8] sm:$0xff]   ;;  %v1917_v58 = vld [vmem:[#allocation5 + $0x150] sm:$0xff]   ;;  %v1921_v62 = vld [vmem:[#allocation5 + $0x158] sm:$0xff]  }
  0x35   :  { %v1915_v55 = vld [vmem:[#allocation5 + $0x108] sm:$0xff]   ;;  %v1918_v59 = vld [vmem:[#allocation5 + $0x1d0] sm:$0xff]   ;;  %v1922_v63 = vld [vmem:[#allocation5 + $0x1d8] sm:$0xff]  }
  0x36   :  { %1714 = vmatpush3.bf16.msra.mxu0 %v1890_v14  ;;  %v201_v43 = vcombine.high %v193_v40, %v193_v40  ;;  %v209_v44 = vrot.slane %v193_v40, %v2207_v35  ;;  %v2212_v45 = vrot.slane %v186_v39, %v2207_v35  ;;  %v1916_v56 = vld [vmem:[#allocation5 + $0x188] sm:$0xff]   ;;  %v1919_v60 = vld [vmem:[#allocation5 + $0x110] sm:$0xff]   ;;  %v1923_v0 = vld [vmem:[#allocation5 + $0x118] sm:$0xff]  }
  0x37   :  { %1736 = vmatpush3.bf16.msra.mxu1 %v1891_v15  ;;  %1715 = vmatprep.subr.bf16.mxu0 %v1892_v16  ;;  %v1920_v61 = vld [vmem:[#allocation5 + $0x190] sm:$0xff]   ;;  %v1924_v1 = vld [vmem:[#allocation5 + $0x198] sm:$0xff]   ;;  %v1925_v2 = vld [vmem:[#allocation5 + $0x160] sm:$0xff]  }
  0x38   :  { %1737 = vmatprep.subr.bf16.mxu1 %v1893_v17  ;;  %v223_v47 = vrot.slane %v201_v43, %v2207_v35  ;;  %v202_v49 = vcombine.high %v2212_v45, %v2212_v45  ;;  %v231_v50 = vcombine.high %v209_v44, %v209_v44  ;;  %v1926_v3 = vld [vmem:[#allocation5 + $0x1e0] sm:$0xff]   ;;  %v1929_v6 = vld [vmem:[#allocation5 + $0x168] sm:$0xff]   ;;  %v1933_v10 = vld [vmem:[#allocation5 + $0x170] sm:$0xff]  }
  0x39   :  { %v1927_v4 = vld [vmem:[#allocation5 + $0x120] sm:$0xff]   ;;  %v1930_v7 = vld [vmem:[#allocation5 + $0x1e8] sm:$0xff]   ;;  %v1934_v11 = vld [vmem:[#allocation5 + $0x1f0] sm:$0xff]  }
  0x3a   :  { %1716 = vmatpush3.bf16.msra.mxu0 %v1894_v18  ;;  %659 = vmatprep.mubr.bf16.mxu0 %v223_v47  ;;  %v233_v52 = vcombine.high %v223_v47, %v223_v47  ;;  %v230_v54 = vrot.slane %v202_v49, %v2207_v35  ;;  %v1928_v5 = vld [vmem:[#allocation5 + $0x1a0] sm:$0xff]   ;;  %v1931_v8 = vld [vmem:[#allocation5 + $0x128] sm:$0xff]   ;;  %v1935_v12 = vld [vmem:[#allocation5 + $0x130] sm:$0xff]   ;;  %v216_v18 = vrot.slane %v2212_v45, %v2207_v35 }
  0x3b   :  { %1738 = vmatpush3.bf16.msra.mxu1 %v1895_v19  ;;  %1717 = vmatprep.subr.bf16.mxu0 %v1896_v20  ;;  %v1932_v9 = vld [vmem:[#allocation5 + $0x1a8] sm:$0xff]   ;;  %v1936_v13 = vld [vmem:[#allocation5 + $0x1b0] sm:$0xff]   ;;  %v1937_v14 = vld [vmem:[#allocation5 + $0x178] sm:$0xff]  }
  0x3c   :  { %1739 = vmatprep.subr.bf16.mxu1 %v1897_v21  ;;  %699 = vmatprep.mubr.bf16.mxu1 %v233_v52  ;;  %v234_v57 = vcombine.high %v230_v54, %v230_v54  ;;  %v1938_v15 = vld [vmem:[#allocation5 + $0x1f8] sm:$0xff]   ;;  %v232_v19 = vcombine.high %v216_v18, %v216_v18  ;;  %v1941_v47 = vld [vmem:[#allocation5 + $0x40] sm:$0xff]   ;;  %v1946_v52 = vld [vmem:[#allocation5 + $0xc8] sm:$0xff]  }
  0x3d   :  { %v1939_v16 = vld [vmem:[#allocation5 + $0x138] sm:$0xff]   ;;  %v1943_v49 = vld [vmem:[#allocation5] sm:$0xff]  }
  0x3e   :  { %1718 = vmatpush3.bf16.msra.mxu0 %v1898_v25  ;;  %v1940_v17 = vld [vmem:[#allocation5 + $0x1b8] sm:$0xff]  }
  0x3f   :  { %1740 = vmatpush3.bf16.msra.mxu1 %v1899_v26  ;;  %1719 = vmatprep.subr.bf16.mxu0 %v1900_v27  ;;  %v1578_v21 = vld [vmem:[%s2281_s2] ss:$0 sm:$0xff] }
  0x40   :  { %1741 = vmatprep.subr.bf16.mxu1 %v1901_v28 }
  0x42   :  { %1720 = vmatpush3.bf16.msra.mxu0 %v1902_v31 }
  0x43   :  { %1742 = vmatpush3.bf16.msra.mxu1 %v1903_v32  ;;  %1721 = vmatprep.subr.bf16.mxu0 %v1904_v33 }
  0x44   :  { %1743 = vmatprep.subr.bf16.mxu1 %v1905_v34 }
  0x46   :  { %1722 = vmatpush3.bf16.msra.mxu0 %v1906_v36 }
  0x47   :  { %1744 = vmatpush3.bf16.msra.mxu1 %v1907_v37  ;;  %1751 = vmatprep.subr.bf16.mxu0 %v1909_v41 }
  0x48   :  { %1773 = vmatprep.subr.bf16.mxu1 %v1910_v42 }
  0x49   :  { %660 = vmatmul.mubr.bf16.vlgmr.msra.gmra.mrb[0].mxu0 %v209_v44 }
  0x4a   :  { %1752 = vmatpush3.bf16.msra.mxu0 %v1911_v46  ;;  %700 = vmatmul.mubr.bf16.vlgmr.msra.gmra.mrb[0].mxu1 %v231_v50  ;;  %v1944_v50 = vld [vmem:[#allocation5 + $0x80] sm:$0xff]  }
  0x4b   :  { %1753 = vmatprep.subr.bf16.mxu0 %v1913_v51  ;;  %1774 = vmatpush3.bf16.msra.mxu1 %v1912_v48  ;;  %v1942_v48 = vld [vmem:[#allocation5 + $0xc0] sm:$0xff]   ;;  %v1945_v51 = vld [vmem:[#allocation5 + $0x48] sm:$0xff]  }
  0x4c   :  { %739 = vmatprep.mubr.bf16.mxu0 %v230_v54  ;;  %1775 = vmatprep.subr.bf16.mxu1 %v1914_v53  ;;  %v1947_v53 = vld [vmem:[#allocation5 + $0x8] sm:$0xff]  }
  0x4d   :  { %779 = vmatprep.mubr.bf16.mxu1 %v234_v57  ;;  %v1948_v54 = vld [vmem:[#allocation5 + $0x88] sm:$0xff]   ;;  %v1951_v57 = vld [vmem:[#allocation5 + $0x10] sm:$0xff]  }
  0x4e   :  { %1754 = vmatpush3.bf16.msra.mxu0 %v1915_v55  ;;  %v1949_v55 = vld [vmem:[#allocation5 + $0x50] sm:$0xff]  }
  0x4f   :  { %1755 = vmatprep.subr.bf16.mxu0 %v1917_v58  ;;  %1776 = vmatpush3.bf16.msra.mxu1 %v1916_v56  ;;  %v1950_v56 = vld [vmem:[#allocation5 + $0xd0] sm:$0xff]  }
  0x50   :  { %1777 = vmatprep.subr.bf16.mxu1 %v1918_v59  ;;  %v1952_v58 = vld [vmem:[#allocation5 + $0x90] sm:$0xff]   ;;  %v1953_v59 = vld [vmem:[#allocation5 + $0x58] sm:$0xff]  }
  0x52   :  { %1756 = vmatpush3.bf16.msra.mxu0 %v1919_v60  ;;  %v1954_v60 = vld [vmem:[#allocation5 + $0xd8] sm:$0xff]  }
  0x53   :  { %1757 = vmatprep.subr.bf16.mxu0 %v1921_v62  ;;  %1778 = vmatpush3.bf16.msra.mxu1 %v1920_v61  ;;  %v1955_v61 = vld [vmem:[#allocation5 + $0x18] sm:$0xff]  }
  0x54   :  { %1779 = vmatprep.subr.bf16.mxu1 %v1922_v63  ;;  %v1956_v62 = vld [vmem:[#allocation5 + $0x98] sm:$0xff]   ;;  %v1957_v63 = vld [vmem:[#allocation5 + $0x60] sm:$0xff]  }
  0x56   :  { %1758 = vmatpush3.bf16.msra.mxu0 %v1923_v0  ;;  %v1958_v0 = vld [vmem:[#allocation5 + $0xe0] sm:$0xff]  }
  0x57   :  { %1759 = vmatprep.subr.bf16.mxu0 %v1925_v2  ;;  %1780 = vmatpush3.bf16.msra.mxu1 %v1924_v1  ;;  %v1959_v1 = vld [vmem:[#allocation5 + $0x20] sm:$0xff]  }
  0x58   :  { %1781 = vmatprep.subr.bf16.mxu1 %v1926_v3  ;;  %v1960_v2 = vld [vmem:[#allocation5 + $0xa0] sm:$0xff]   ;;  %v1961_v3 = vld [vmem:[#allocation5 + $0x68] sm:$0xff]  }
  0x5a   :  { %1760 = vmatpush3.bf16.msra.mxu0 %v1927_v4  ;;  %v1962_v4 = vld [vmem:[#allocation5 + $0xe8] sm:$0xff]  }
  0x5b   :  { %1761 = vmatprep.subr.bf16.mxu0 %v1929_v6  ;;  %1782 = vmatpush3.bf16.msra.mxu1 %v1928_v5  ;;  %v1963_v5 = vld [vmem:[#allocation5 + $0x28] sm:$0xff]  }
  0x5c   :  { %1783 = vmatprep.subr.bf16.mxu1 %v1930_v7  ;;  %v1964_v6 = vld [vmem:[#allocation5 + $0xa8] sm:$0xff]  }
  0x5e   :  { %1762 = vmatpush3.bf16.msra.mxu0 %v1931_v8 }
  0x5f   :  { %1763 = vmatprep.subr.bf16.mxu0 %v1933_v10  ;;  %1784 = vmatpush3.bf16.msra.mxu1 %v1932_v9 }
  0x60   :  { %1785 = vmatprep.subr.bf16.mxu1 %v1934_v11 }
  0x62   :  { %1764 = vmatpush3.bf16.msra.mxu0 %v1935_v12  ;;  %v1965_v12 = vld [vmem:[#allocation5 + $0x70] sm:$0xff]  }
  0x63   :  { %1765 = vmatprep.subr.bf16.mxu0 %v1937_v14  ;;  %1786 = vmatpush3.bf16.msra.mxu1 %v1936_v13  ;;  %v1966_v13 = vld [vmem:[#allocation5 + $0xf0] sm:$0xff]  }
  0x64   :  { %1787 = vmatprep.subr.bf16.mxu1 %v1938_v15  ;;  %v1967_v14 = vld [vmem:[#allocation5 + $0x30] sm:$0xff]  }
  0x65   :  { %v1968_v15 = vld [vmem:[#allocation5 + $0xb0] sm:$0xff]  }
  0x66   :  { %1766 = vmatpush3.bf16.msra.mxu0 %v1939_v16  ;;  %v1969_v16 = vld [vmem:[#allocation5 + $0x78] sm:$0xff]  }
  0x67   :  { %1788 = vmatpush3.bf16.msra.mxu1 %v1940_v17  ;;  %1795 = vmatprep.subr.bf16.mxu0 %v1941_v47  ;;  %v1970_v17 = vld [vmem:[#allocation5 + $0xf8] sm:$0xff]  }
  0x68   :  { %1813 = vmatprep.subr.bf16.mxu1 %v1942_v48  ;;  %v1987_v47 = vld [vmem:[#allocation5 + $0x118] sm:$0xff]  }
  0x69   :  { %740 = vmatmul.mubr.bf16.vlgmr.msra.gmra.mrb[4].mxu0 %v216_v18  ;;  %v1971_v18 = vld [vmem:[#allocation5 + $0x38] sm:$0xff]  }
  0x6a   :  { %780 = vmatmul.mubr.bf16.vlgmr.msra.gmra.mrb[4].mxu1 %v232_v19  ;;  %v1972_v19 = vld [vmem:[#allocation5 + $0xb8] sm:$0xff]  }
  0x6b   :  { %v1988_v48 = vld [vmem:[#allocation5 + $0x198] sm:$0xff]  }
  0x6f   :  { %1796 = vmatpush3.bf16.xpose.msra.mxu0 %v1943_v49  ;;  %v1989_v49 = vld [vmem:[#allocation5 + $0x160] sm:$0xff]  }
  0x70   :  { %1814 = vmatpush3.bf16.xpose.msra.mxu1 %v1944_v50  ;;  %1797 = vmatprep.subr.bf16.mxu0 %v1945_v51  ;;  %v1990_v50 = vld [vmem:[#allocation5 + $0x1e0] sm:$0xff]  }
  0x71   :  { %1815 = vmatprep.subr.bf16.mxu1 %v1946_v52  ;;  %v1991_v51 = vld [vmem:[#allocation5 + $0x120] sm:$0xff]  }
  0x72   :  { %v1992_v52 = vld [vmem:[#allocation5 + $0x1a0] sm:$0xff]  }
  0x77   :  { %1798 = vmatpush3.bf16.xpose.msra.mxu0 %v1947_v53  ;;  %v1993_v53 = vld [vmem:[#allocation5 + $0x168] sm:$0xff]  }
  0x78   :  { %1816 = vmatpush3.bf16.xpose.msra.mxu1 %v1948_v54  ;;  %1799 = vmatprep.subr.bf16.mxu0 %v1949_v55  ;;  %v1994_v54 = vld [vmem:[#allocation5 + $0x1e8] sm:$0xff]  }
  0x79   :  { %1817 = vmatprep.subr.bf16.mxu1 %v1950_v56  ;;  %v1995_v55 = vld [vmem:[#allocation5 + $0x128] sm:$0xff]  }
  0x7a   :  { %v1996_v56 = vld [vmem:[#allocation5 + $0x1a8] sm:$0xff]  }
  0x7f   :  { %1800 = vmatpush3.bf16.xpose.msra.mxu0 %v1951_v57  ;;  %v1997_v57 = vld [vmem:[#allocation5 + $0x170] sm:$0xff]  }
  0x80   :  { %1818 = vmatpush3.bf16.xpose.msra.mxu1 %v1952_v58  ;;  %1801 = vmatprep.subr.bf16.mxu0 %v1953_v59  ;;  %v1998_v58 = vld [vmem:[#allocation5 + $0x1f0] sm:$0xff]  }
  0x81   :  { %1819 = vmatprep.subr.bf16.mxu1 %v1954_v60  ;;  %v1999_v59 = vld [vmem:[#allocation5 + $0x130] sm:$0xff]  }
  0x82   :  { %v2000_v60 = vld [vmem:[#allocation5 + $0x1b0] sm:$0xff]  }
  0x87   :  { %1802 = vmatpush3.bf16.xpose.msra.mxu0 %v1955_v61  ;;  %v2001_v61 = vld [vmem:[#allocation5 + $0x178] sm:$0xff]  }
  0x88   :  { %1820 = vmatpush3.bf16.xpose.msra.mxu1 %v1956_v62  ;;  %1803 = vmatprep.subr.bf16.mxu0 %v1957_v63  ;;  %v2002_v62 = vld [vmem:[#allocation5 + $0x1f8] sm:$0xff]  }
  0x89   :  { %1821 = vmatprep.subr.bf16.mxu1 %v1958_v0  ;;  %v2003_v63 = vld [vmem:[#allocation5 + $0x138] sm:$0xff]  }
  0x8a   :  { %v2004_v0 = vld [vmem:[#allocation5 + $0x1b8] sm:$0xff]  }
  0x8f   :  { %1804 = vmatpush3.bf16.xpose.msra.mxu0 %v1959_v1 }
  0x90   :  { %1822 = vmatpush3.bf16.xpose.msra.mxu1 %v1960_v2  ;;  %1805 = vmatprep.subr.bf16.mxu0 %v1961_v3 }
  0x91   :  { %1823 = vmatprep.subr.bf16.mxu1 %v1962_v4 }
  0x97   :  { %1806 = vmatpush3.bf16.xpose.msra.mxu0 %v1963_v5 }
  0x98   :  { %1824 = vmatpush3.bf16.xpose.msra.mxu1 %v1964_v6  ;;  %1807 = vmatprep.subr.bf16.mxu0 %v1965_v12 }
  0x99   :  { %1825 = vmatprep.subr.bf16.mxu1 %v1966_v13 }
  0x9f   :  { %1808 = vmatpush3.bf16.xpose.msra.mxu0 %v1967_v14 }
  0xa0   :  { %1826 = vmatpush3.bf16.xpose.msra.mxu1 %v1968_v15  ;;  %1809 = vmatprep.subr.bf16.mxu0 %v1969_v16 }
  0xa1   :  { %1827 = vmatprep.subr.bf16.mxu1 %v1970_v17 }
  0xa7   :  { %1810 = vmatpush3.bf16.xpose.msra.mxu0 %v1971_v18 }
  0xa8   :  { %1828 = vmatpush3.bf16.xpose.msra.mxu1 %v1972_v19 }
 0x11c   :  { %v1723_v20 = vpop.f32.mrb[0].mxu0 }
 0x11d   :  { %v1724_v22 = vpop.f32.mrb[1].mxu0  ;;  %v1745_v23 = vpop.f32.mrb[0].mxu1 }
 0x11e   :  { %v1725_v24 = vadd.f32 %v1724_v22, %v1723_v20  ;;  %v1726_v25 = vpop.f32.mrb[2].mxu0  ;;  %v1746_v26 = vpop.f32.mrb[1].mxu1  ;;  %v1973_v20 = vld [vmem:[#allocation5 + $0x140] sm:$0xff]  }
 0x11f   :  { %v1727_v27 = vpop.f32.mrb[3].mxu0  ;;  %v1747_v29 = vadd.f32 %v1746_v26, %v1745_v23  ;;  %v1748_v31 = vpop.f32.mrb[2].mxu1  ;;  %1831 = vmatprep.subr.bf16.mxu0 %v1973_v20  ;;  %v810_v25 = vld [vmem:[%s2282_s3] sm:$0x3] }
 0x120   :  { %v662_v28 = vadd.f32 %v1725_v24, %v1578_v21  ;;  %v1749_v32 = vpop.f32.mrb[3].mxu1  ;;  %v1974_v21 = vld [vmem:[#allocation5 + $0x1c0] sm:$0xff]  }
 0x121   :  { %1849 = vmatprep.subr.bf16.mxu1 %v1974_v21 }
 0x122   :  { %v702_v33 = vadd.f32 %v1747_v29, %v662_v28  ;;  %v801_v28 = vld [vmem:[%s2282_s3] sm:$0x3]  ;;  %s2134_s3 = smov [#allocation8]  }
 0x123   :  { %s1551_s26 = sshll.u32 %s2134_s3, 4  ;;  %s1552_s26 = int_to_ptr.vmem [resolvable:$true] %s1551_s26 }
 0x124   :  { %s2055_s29 = scalar_lea.vmem %s1552_s26, 32  ;;  %p2060_p3 = scmp.lt.s32.totalorder %s1552_s26, %s1552_s26 }
 0x125   :  { %p2056_p2 = scmp.ne.s32.totalorder %s1552_s26, %s2055_s29  ;;  %p2061_p4 = scmp.lt.s32.totalorder %s2055_s29, %s2055_s29 }
 0x127   :  { %p2062_p5 = por %p2061_p4, %p2060_p3 }
 0x129   :  { %p2063_p6 = pnand %p2062_p5, %p2056_p2 }
 0x13c   :  { %v1767_v34 = vpop.f32.mrb[4].mxu0 }
 0x13d   :  { %v1768_v35 = vpop.f32.mrb[5].mxu0  ;;  %v1789_v36 = vpop.f32.mrb[4].mxu1 }
 0x13e   :  { %v1769_v37 = vadd.f32 %v1768_v35, %v1767_v34  ;;  %v1770_v38 = vpop.f32.mrb[6].mxu0  ;;  %v1790_v39 = vpop.f32.mrb[5].mxu1  ;;  %v1975_v34 = vld [vmem:[#allocation5 + $0x100] sm:$0xff]  }
 0x13f   :  { %v1771_v40 = vpop.f32.mrb[7].mxu0  ;;  %v1791_v42 = vadd.f32 %v1790_v39, %v1789_v36  ;;  %v1792_v43 = vpop.f32.mrb[6].mxu1  ;;  %v1976_v35 = vld [vmem:[#allocation5 + $0x180] sm:$0xff]   ;;  %v1978_v38 = vld [vmem:[#allocation5 + $0x1c8] sm:$0xff]  }
 0x140   :  { %v742_v41 = vadd.f32 %v1769_v37, %v702_v33  ;;  %v1793_v44 = vpop.f32.mrb[7].mxu1  ;;  %v1977_v37 = vld [vmem:[#allocation5 + $0x148] sm:$0xff]   ;;  %v1983_v43 = vld [vmem:[#allocation5 + $0x110] sm:$0xff]  }
 0x141   :  { %v1979_v39 = vld [vmem:[#allocation5 + $0x108] sm:$0xff]   ;;  %v1984_v44 = vld [vmem:[#allocation5 + $0x190] sm:$0xff]  }
 0x142   :  { %v782_v45 = vadd.f32 %v1791_v42, %v742_v41  ;;  %v1980_v40 = vld [vmem:[#allocation5 + $0x188] sm:$0xff]   ;;  %v1981_v41 = vld [vmem:[#allocation5 + $0x150] sm:$0xff]  }
 0x143   :  { %v1982_v42 = vld [vmem:[#allocation5 + $0x1d0] sm:$0xff]  }
 0x144   :  { %787 = vst [vmem:[#allocation7] sm:$0x3] %v782_v45  ;;  %v789_v46 = vsel %vm788_vm0, %v782_v45, -inf }
 0x145   :  { %790 = vmax.xlane.f32.xlu0 %v789_v46  ;;  %v1986_v46 = vld [vmem:[#allocation5 + $0x1d8] sm:$0xff]  }
 0x1d2   :  { %v791_v7 = vpop.xlane.xlu0 %790 }
 0x1d3   :  { %v792_v8 = vsub.f32 %v782_v45, %v791_v7  ;;  %v1985_v45 = vld [vmem:[#allocation5 + $0x158] sm:$0xff]  }
 0x1d5   :  { %v793_v9 = vmul.f32 1.442695, %v792_v8 }
 0x1d7   :  { %2005 = vpow2.f32 %v793_v9 }
 0x1e1   :  { %v2006_v10 = vpop.eup %2005 }
 0x1e2   :  { %v795_v11 = vsel %vm788_vm0, %v2006_v10, 0.0 }
 0x1e3   :  { %796 = vadd.xlane.f32.xlu0 %v795_v11 }
 0x270   :  { %v797_v22 = vpop.xlane.xlu0 %796 }
 0x271   :  { %2007 = vlog2.f32 %v797_v22 }
 0x272   :  { %2009 = vrcp.f32 %v797_v22 }
 0x27b   :  { %v2008_v23 = vpop.eup %2007 }
 0x27c   :  { %v2010_v24 = vpop.eup %2009  ;;  %v799_v26 = vmul.f32 0.6931472, %v2008_v23 }
 0x27d   :  { %v809_v27 = vmul.f32 %v2010_v24, %v2006_v10 }
 0x27e   :  { %v800_v29 = vsub.f32 %v792_v8, %v799_v26 }
 0x27f   :  { %v811_v31 = vsub.f32 %v809_v27, %v810_v25 }
 0x280   :  { %v802_v32 = vmul.f32 %v801_v28, %v800_v29 }
 0x281   :  { %v2231_v33 = vpack.c.bf16 %v811_v31, %v811_v31 }
 0x282   :  { %v803_v36 = vsel %vm788_vm0, %v802_v32, 0.0 }
 0x283   :  { %1811 = vmatprep.mubr.bf16.mxu0 %v2231_v33  ;;  %1829 = vmatprep.mubr.bf16.mxu1 %v2231_v33 }
 0x284   :  { %1812 = vmatmul.mubr.bf16.vlgmr.msra.gmra.mrb[8].mxu0 %v2231_v33  ;;  %1830 = vmatmul.mubr.bf16.vlgmr.msra.gmra.mrb[8].mxu1 %v2231_v33 }
 0x285   :  { %1832 = vmatpush3.bf16.xpose.msra.mxu0 %v1975_v34  ;;  %1850 = vmatpush3.bf16.xpose.msra.mxu1 %v1976_v35 }
 0x286   :  { %804 = vadd.xlane.f32.xlu1 %v803_v36  ;;  %1847 = vmatprep.mubr.bf16.mxu0 %v2231_v33 }
 0x287   :  { %1865 = vmatprep.mubr.bf16.mxu1 %v2231_v33  ;;  %1833 = vmatprep.subr.bf16.mxu0 %v1977_v37 }
 0x288   :  { %1851 = vmatprep.subr.bf16.mxu1 %v1978_v38 }
 0x28d   :  { %1834 = vmatpush3.bf16.xpose.msra.mxu0 %v1979_v39  ;;  %1852 = vmatpush3.bf16.xpose.msra.mxu1 %v1980_v40 }
 0x28e   :  { %1835 = vmatprep.subr.bf16.mxu0 %v1981_v41  ;;  %1853 = vmatprep.subr.bf16.mxu1 %v1982_v42 }
 0x295   :  { %1836 = vmatpush3.bf16.xpose.msra.mxu0 %v1983_v43  ;;  %1854 = vmatpush3.bf16.xpose.msra.mxu1 %v1984_v44 }
 0x296   :  { %1837 = vmatprep.subr.bf16.mxu0 %v1985_v45  ;;  %1855 = vmatprep.subr.bf16.mxu1 %v1986_v46 }
 0x29d   :  { %1838 = vmatpush3.bf16.xpose.msra.mxu0 %v1987_v47  ;;  %1856 = vmatpush3.bf16.xpose.msra.mxu1 %v1988_v48 }
 0x29e   :  { %1839 = vmatprep.subr.bf16.mxu0 %v1989_v49  ;;  %1857 = vmatprep.subr.bf16.mxu1 %v1990_v50 }
 0x2a5   :  { %1840 = vmatpush3.bf16.xpose.msra.mxu0 %v1991_v51  ;;  %1858 = vmatpush3.bf16.xpose.msra.mxu1 %v1992_v52 }
 0x2a6   :  { %1841 = vmatprep.subr.bf16.mxu0 %v1993_v53  ;;  %1859 = vmatprep.subr.bf16.mxu1 %v1994_v54 }
 0x2ad   :  { %1842 = vmatpush3.bf16.xpose.msra.mxu0 %v1995_v55  ;;  %1860 = vmatpush3.bf16.xpose.msra.mxu1 %v1996_v56 }
 0x2ae   :  { %1843 = vmatprep.subr.bf16.mxu0 %v1997_v57  ;;  %1861 = vmatprep.subr.bf16.mxu1 %v1998_v58 }
 0x2b5   :  { %1844 = vmatpush3.bf16.xpose.msra.mxu0 %v1999_v59  ;;  %1862 = vmatpush3.bf16.xpose.msra.mxu1 %v2000_v60 }
 0x2b6   :  { %1845 = vmatprep.subr.bf16.mxu0 %v2001_v61  ;;  %1863 = vmatprep.subr.bf16.mxu1 %v2002_v62 }
 0x2bd   :  { %1846 = vmatpush3.bf16.xpose.msra.mxu0 %v2003_v63  ;;  %1864 = vmatpush3.bf16.xpose.msra.mxu1 %v2004_v0 }
 0x2c4   :  { %1848 = vmatmul.mubr.bf16.vlgmr.msra.gmra.mrb[12].mxu0 %v2231_v33  ;;  %1866 = vmatmul.mubr.bf16.vlgmr.msra.gmra.mrb[12].mxu1 %v2231_v33 }
 0x313   :  { %v805_v1 = vpop.xlane.xlu1 %804 }
 0x314   :  { %v806_v2 = vsub.f32 0.0, %v805_v1 }
 0x316   :  { %807 = vst [vmem:[#allocation8] sm:$0x3] %v806_v2 }
 0x317   :  { %2066 = shalt.err (!%p2063_p6)
}
 0x318   :  { %s2067_s8 = scalar_lea.hbm %s2284_s5, 32 }
 0x319   :  { %p2068_p7 = scmp.ne.s32.totalorder %s2284_s5, %s2067_s8  ;;  %p2071_p8 = scmp.lt.u32.totalorder %s2067_s8, %s2284_s5 }
 0x31b   :  { %p2073_p9 = pnand %p2071_p8, %p2068_p7 }
 0x31d   :  { %2076 = shalt.err (!%p2073_p9)
}
 0x31e   :  { %1554 = dma.vmem_to_hbm [thread:$0]  %s1552_s26, 32, %s2284_s5, [#allocation9]  }
 0x31f   :  { %s2077_s15 = scalar_lea.vmem %s1542_s28, 32  ;;  %p2082_p11 = scmp.lt.s32.totalorder %s1542_s28, %s1542_s28 }
 0x320   :  { %p2078_p10 = scmp.ne.s32.totalorder %s1542_s28, %s2077_s15  ;;  %p2083_p12 = scmp.lt.s32.totalorder %s2077_s15, %s2077_s15 }
 0x322   :  { %p2084_p13 = por %p2083_p12, %p2082_p11 }
 0x324   :  { %p2085_p0 = pnand %p2084_p13, %p2078_p10 }
 0x326   :  { %2088 = shalt.err (!%p2085_p0)
}
 0x327   :  { %s2089_s18 = scalar_lea.hbm %s2283_s4, 32 }
 0x328   :  { %p2090_p1 = scmp.ne.s32.totalorder %s2283_s4, %s2089_s18  ;;  %p2093_p2 = scmp.lt.u32.totalorder %s2089_s18, %s2283_s4 }
 0x32a   :  { %p2095_p3 = pnand %p2093_p2, %p2090_p1 }
 0x32c   :  { %2098 = shalt.err (!%p2095_p3)
}
 0x32d   :  { %1544 = dma.vmem_to_hbm [thread:$0]  %s1542_s28, 32, %s2283_s4, [#allocation4]   ;;  %v2136_v3 = vmov 1983009808  }
 0x32e   :  { %v1500_v4 = vunpack.c.l.s4 %v2136_v3  ;;  %s2137_s4 = smov [#allocation10]  }
 0x32f   :  { %s1561_s22 = sshll.u32 %s2137_s4, 4  ;;  %s1562_s22 = int_to_ptr.vmem [resolvable:$true] %s1561_s22 }
 0x330   :  { %v1501_v5 = vunpack.c.0.s8 %v1500_v4  ;;  %s2099_s2 = scalar_lea.vmem %s1562_s22, 256  ;;  %p2104_p5 = scmp.lt.s32.totalorder %s1562_s22, %s1562_s22 }
 0x331   :  { %p2100_p4 = scmp.ne.s32.totalorder %s1562_s22, %s2099_s2  ;;  %p2105_p6 = scmp.lt.s32.totalorder %s2099_s2, %s2099_s2 }
 0x332   :  { %v1504_v8 = vsub.s32 %v1501_v5, %v2204_v30 }
 0x333   :  { %p2106_p7 = por %p2105_p6, %p2104_p5 }
 0x335   :  { %p2107_p8 = pnand %p2106_p7, %p2100_p4 }
 0x357   :  { %v1359_v6 = vpop.f32.mrb[8].mxu0  ;;  %v1400_v7 = vpop.f32.mrb[8].mxu1 }
 0x358   :  { %v1361_v9 = vpop.f32.mrb[9].mxu0  ;;  %v1402_v10 = vpop.f32.mrb[9].mxu1 }
 0x359   :  { %v1497_v11 = vcombine.low %v1359_v6, %v1361_v9  ;;  %v1498_v12 = vcombine.low %v1400_v7, %v1402_v10  ;;  %v1363_v13 = vpop.f32.mrb[10].mxu0  ;;  %v1404_v14 = vpop.f32.mrb[10].mxu1 }
 0x35a   :  { %v1364_v15 = vpop.f32.mrb[11].mxu0  ;;  %v1405_v16 = vpop.f32.mrb[11].mxu1 }
 0x35b   :  { %v1505_v17 = vrot.slane %v1497_v11, %v1504_v8  ;;  %v1512_v18 = vrot.slane %v1498_v12, %v1504_v8 }
 0x35d   :  { %v1513_v19 = vcombine.low %v1505_v17, %v1512_v18 }
 0x35f   :  { %1533 = vst [vmem:[#allocation10] sm:$0xff] %v1513_v19 }
 0x397   :  { %v1441_v20 = vpop.f32.mrb[12].mxu0  ;;  %v1482_v21 = vpop.f32.mrb[12].mxu1 }
 0x398   :  { %v1443_v22 = vpop.f32.mrb[13].mxu0  ;;  %v1484_v23 = vpop.f32.mrb[13].mxu1 }
 0x399   :  { %v1514_v24 = vcombine.low %v1441_v20, %v1443_v22  ;;  %v1515_v25 = vcombine.low %v1482_v21, %v1484_v23  ;;  %v1445_v26 = vpop.f32.mrb[14].mxu0  ;;  %v1486_v30 = vpop.f32.mrb[14].mxu1 }
 0x39a   :  { %v1446_v27 = vpop.f32.mrb[15].mxu0  ;;  %v1487_v28 = vpop.f32.mrb[15].mxu1 }
 0x39b   :  { %v1522_v29 = vrot.slane %v1514_v24, %v1504_v8  ;;  %v1529_v31 = vrot.slane %v1515_v25, %v1504_v8 }
 0x39d   :  { %v1530_v32 = vcombine.low %v1522_v29, %v1529_v31 }
 0x39f   :  { %1534 = vst [vmem:[#allocation10 + $0x8] sm:$0xff] %v1530_v32 }
 0x3a0   :  { %2110 = shalt.err (!%p2107_p8)
}
 0x3a1   :  { %s2111_s25 = scalar_lea.hbm %s2285_s6, 256 }
 0x3a2   :  { %p2112_p9 = scmp.ne.s32.totalorder %s2285_s6, %s2111_s25  ;;  %p2115_p10 = scmp.lt.u32.totalorder %s2111_s25, %s2285_s6 }
 0x3a4   :  { %p2117_p11 = pnand %p2115_p10, %p2112_p9 }
 0x3a6   :  { %2120 = shalt.err (!%p2117_p11)
}
 0x3a7   :  { %1564 = dma.vmem_to_hbm [thread:$0]  %s1562_s22, 256, %s2285_s6, [#allocation9]  }
 0x3a8   :  { %2125 = dma.done.wait [#allocation4], 32  }
 0x3a9   :  { %2126 = vsyncadd [#allocation4], 4294967264 }
 0x3aa   :  { %2127 = dma.done.wait [#allocation9], 288  }
 0x3ab   :  { %2128 = vsyncadd [#allocation9], 4294967008 }
 0x3ac   :  { %1574 = vsyncpa [#allocation3], 1 }
 0x3ad   :  { %1575 = vsyncpa [#allocation6], 1 }
 0x3ae   :  { %1576 = vsyncpa [#allocation4], 1 }
 0x3af   :  { %1577 = vsyncpa [#allocation9], 1 }

</bundles_post_ra>
